<compile_context>
chip_gen: v7x
topology: tpu7x:2x2x1
jax: 0.10.0
libtpu: 0.0.40
codegen_flags: <defaults>
</compile_context>

<pallas_src>
import functools

import jax
import jax.numpy as jnp
from jax.experimental import pallas as pl
from jax.experimental.pallas import tpu as pltpu


def _round_up(n, m):
    return ((n + m - 1) // m) * m


# ---------------------------------------------------------------------------
# Kernel body: one batch tile, all three layers fused, weights resident.
# ---------------------------------------------------------------------------
def mlp_kernel(x_ref, w0_ref, b0_ref, w1_ref, b1_ref, w2_ref, b2_ref, o_ref):
    """out = relu(relu(x@W0+b0)@W1+b1)@W2+b2 for one batch tile.

    MXU matmuls accumulate in f32; the bias-add/ReLU epilogue stays f32
    (works on v5e's f32-only VPU). Hidden activations are cast back to the
    weight dtype so bf16 weights keep the bf16 MXU feed on v5e/v6e/v7x.
    """
    cdtype = w0_ref.dtype
    h = jnp.dot(x_ref[...], w0_ref[...], preferred_element_type=jnp.float32)
    h = jnp.maximum(h + b0_ref[...], 0.0)
    h = jnp.dot(h.astype(cdtype), w1_ref[...], preferred_element_type=jnp.float32)
    h = jnp.maximum(h + b1_ref[...], 0.0)
    out = jnp.dot(h.astype(cdtype), w2_ref[...], preferred_element_type=jnp.float32)
    o_ref[...] = (out + b2_ref[...]).astype(o_ref.dtype)


# ---------------------------------------------------------------------------
# One-time static capability / hardware queries (cached, not per-call).
# ---------------------------------------------------------------------------
@functools.lru_cache(maxsize=1)
def _single_buffer_supported():
    """Static one-time check that pipeline_mode=pl.Buffered(1) lowers on this
    backend. Replaces the fragile per-call try/except fallback."""
    def _probe(x_ref, w_ref, o_ref):
        o_ref[...] = x_ref[...] + w_ref[...]

    try:
        fn = pl.pallas_call(
            _probe,
            out_shape=jax.ShapeDtypeStruct((16, 128), jnp.float32),
            grid=(2,),
            in_specs=[
                pl.BlockSpec((8, 128), lambda i: (i, 0)),
                pl.BlockSpec((8, 128), lambda i: (0, 0),
                             pipeline_mode=pl.Buffered(1)),
            ],
            out_specs=pl.BlockSpec((8, 128), lambda i: (i, 0)),
        )
        jax.jit(fn).lower(
            jax.ShapeDtypeStruct((16, 128), jnp.float32),
            jax.ShapeDtypeStruct((8, 128), jnp.float32),
        ).compile()
        return True
    except Exception:
        return False


@functools.lru_cache(maxsize=1)
def _vmem_budget_bytes():
    """VMEM budget with headroom, derived from the actual chip when possible."""
    try:
        cap = int(pltpu.get_tpu_info().vmem_capacity_bytes)
    except Exception:
        cap = 64 * 2**20  # conservative: v7x per-TensorCore VMEM
    return int(min(cap * 3 // 4, 96 * 2**20))


# ---------------------------------------------------------------------------
# Fused forward: cast/pad/slice live in the SAME jit as the pallas_call.
# ---------------------------------------------------------------------------
@functools.partial(jax.jit, static_argnames=("tile", "single_buffer", "vmem_limit"))
def _fused_mlp(x, w0, b0, w1, b1, w2, b2, *, tile, single_buffer, vmem_limit):
    B, d_in = x.shape
    H = w0.shape[1]
    C = w2.shape[1]
    cdtype = w0.dtype
    out_dtype = jnp.float32

    B_p = _round_up(B, tile)
    xp = x.astype(cdtype)
    if B_p != B:
        # Padded batch rows produce relu(bias)-propagated garbage; they are
        # sliced off before returning.
        xp = jnp.pad(xp, ((0, B_p - B), (0, 0)))
    b0f, b1f, b2f = (b.astype(jnp.float32) for b in (b0, b1, b2))

    grid = (B_p // tile,)
    # Constant index_map on every grid step -> weights never change; a single
    # buffer halves their VMEM footprint. Tiny biases keep default buffering.
    w_mode = dict(pipeline_mode=pl.Buffered(1)) if single_buffer else {}
    const = lambda i: (0, 0)

    itemsize = jnp.dtype(cdtype).itemsize
    flops = 2 * B_p * (d_in * H + H * H + H * C)
    bytes_accessed = (
        B_p * d_in * itemsize                               # x stream
        + (d_in * H + H * H + H * C) * itemsize             # weights (once)
        + (2 * H + C) * 4                                   # biases
        + B_p * C * jnp.dtype(out_dtype).itemsize           # output
    )

    out = pl.pallas_call(
        mlp_kernel,
        out_shape=jax.ShapeDtypeStruct((B_p, C), out_dtype),
        grid_spec=pltpu.PrefetchScalarGridSpec(
            num_scalar_prefetch=0,
            grid=grid,
            in_specs=[
                pl.BlockSpec((tile, d_in), lambda i: (i, 0)),   # x tile (streamed)
                pl.BlockSpec((d_in, H), const, **w_mode),       # W0 (resident)
                pl.BlockSpec((1, H), const),                    # b0
                pl.BlockSpec((H, H), const, **w_mode),          # W1 (resident)
                pl.BlockSpec((1, H), const),                    # b1
                pl.BlockSpec((H, C), const, **w_mode),          # W2 (resident)
                pl.BlockSpec((1, C), const),                    # b2
            ],
            out_specs=pl.BlockSpec((tile, C), lambda i: (i, 0)),
        ),
        compiler_params=pltpu.CompilerParams(
            dimension_semantics=("parallel",),
            vmem_limit_bytes=int(vmem_limit),
        ),
        cost_estimate=pl.CostEstimate(
            flops=int(flops), transcendentals=0, bytes_accessed=int(bytes_accessed)
        ),
    )(xp, w0, b0f, w1, b1f, w2, b2f)

    return out[:B] if B_p != B else out


def net_forward(x, params, *, batch_tile=None):
    """Forward pass of Net (3-layer MLP) as one fused Pallas kernel call.

    `params` may be raw f32 params or the output of `prepare_params`
    (weights pre-cast to bf16 once — hoisted out of the per-call path).
    """
    B, d_in = x.shape
    w0, w2 = params["W0"], params["W2"]
    H = w0.shape[1]
    C = w2.shape[1]
    cdtype = w0.dtype
    itemsize = jnp.dtype(cdtype).itemsize

    # bf16 vregs pack [16,128]: round batch tiles to 16 sublanes for bf16,
    # 8 for f32 (32 would be needed for int8/fp8).
    sublane = max(8, 32 // itemsize)

    single_buffer = _single_buffer_supported()
    budget = _vmem_budget_bytes()

    # Resident-weight footprint (weights single-buffered when supported,
    # biases double-buffered by default).
    wbuf = 1 if single_buffer else 2
    weight_bytes = wbuf * (d_in * H + H * H + H * C) * itemsize + 2 * (2 * H + C) * 4
    if weight_bytes > budget // 2:
        # TODO(synk): for very large hidden sizes (v7x's 64 MiB VMEM), switch to a
        # K-tiled reduction grid over H (tiled W blocks + f32 accumulator scratch
        # with pl.when init/finalize) instead of keeping all weights resident.
        raise ValueError(
            f"Resident weights need {weight_bytes >> 20} MiB which exceeds half of "
            f"the {budget >> 20} MiB VMEM budget; K-tiled variant not implemented.")

    # Derive the batch tile from the VMEM budget. Weights are resident, so the
    # only per-step DMA is the x/out tile: bigger tiles amortize the ~0.35us
    # per-grid-step overhead nearly for free.
    per_row = 2 * d_in * itemsize + 2 * C * 4 + 4 * H * 4
    avail = max(budget - weight_bytes - (4 << 20), per_row * sublane)
    tile_cap = max(sublane, (avail // per_row) // sublane * sublane)
    want = 512 if batch_tile is None else max(int(batch_tile), sublane)
    tile = min(_round_up(want, sublane), tile_cap)
    # Keep >= 2 grid steps when the batch allows it so v7x's second TensorCore
    # gets work (batch axis is "parallel"); costs ~nothing on v5e/v6e.
    tile = min(tile, max(_round_up(pl.cdiv(B, 2), sublane), sublane))
    tile = min(tile, _round_up(B, sublane))
    tile = max(tile, sublane)

    return _fused_mlp(
        x, params["W0"], params["b0"], params["W1"], params["b1"],
        params["W2"], params["b2"],
        tile=int(tile), single_buffer=bool(single_buffer), vmem_limit=int(budget),
    )


def prepare_params(params, compute_dtype=jnp.bfloat16):
    """One-time param prep (hoisted out of the per-call path): cast weights to
    the MXU feed dtype (bf16 recommended on v5e/v6e/v7x); biases stay f32 for
    the f32 VPU epilogue."""
    prepped = {}
    for l in range(3):
        prepped[f"W{l}"] = params[f"W{l}"].astype(compute_dtype)
        prepped[f"b{l}"] = params[f"b{l}"].astype(jnp.float32)
    return prepped


def init_params(key, input_size, num_classes, hidden_layer_factor=2):
    """Deterministic init mimicking PyTorch nn.Linear default (uniform +-1/sqrt(fan_in))."""
    H = input_size * hidden_layer_factor
    dims = [(input_size, H), (H, H), (H, num_classes)]
    params = {}
    for idx, (fan_in, fan_out) in enumerate(dims):
        key, kw, kb = jax.random.split(key, 3)
        bound = 1.0 / jnp.sqrt(jnp.float32(fan_in))
        # stored as (in, out) so the kernel can do x @ W directly
        params[f"W{idx}"] = jax.random.uniform(
            kw, (fan_in, fan_out), jnp.float32, minval=-bound, maxval=bound)
        params[f"b{idx}"] = jax.random.uniform(
            kb, (1, fan_out), jnp.float32, minval=-bound, maxval=bound)
    return params


def net_forward_ref(x, params):
    h = jnp.maximum(x @ params["W0"] + params["b0"], 0.0)
    h = jnp.maximum(h @ params["W1"] + params["b1"], 0.0)
    return h @ params["W2"] + params["b2"]


if __name__ == "__main__":
    # Shapes consistent with Net(input_size=32, num_classes=8, hidden_layer_factor=2, layers=3).
    INPUT_SIZE = 32
    NUM_CLASSES = 8
    BATCH = 16

    key = jax.random.PRNGKey(0)
    key, kx = jax.random.split(key)
    x = jax.random.normal(kx, (BATCH, INPUT_SIZE), jnp.float32)
    params = init_params(key, INPUT_SIZE, NUM_CLASSES, hidden_layer_factor=2)

    ref = net_forward_ref(x, params)

    # f32 path (raw params work directly); tile=8 -> 2 grid steps for BATCH=16.
    out_f32 = jax.block_until_ready(net_forward(x, params))
    assert out_f32.shape == (BATCH, NUM_CLASSES)
    assert jnp.allclose(out_f32, ref, atol=1e-5, rtol=1e-5), "f32 mismatch vs JAX reference"

    # bf16 MXU-feed path: weights pre-cast ONCE via prepare_params (hoisted out
    # of the per-call path). Intentional bf16 quantization of x/weights -> loose tol.
    params_bf16 = prepare_params(params, jnp.bfloat16)
    out_bf16 = jax.block_until_ready(net_forward(x, params_bf16))
    assert jnp.allclose(out_bf16, ref, atol=1e-1, rtol=1e-1), "bf16 mismatch vs JAX reference"

    # Ragged batch (B not a multiple of the tile) exercises in-jit batch
    # padding + slicing and a multi-step "parallel" batch grid.
    x_odd = jax.random.normal(jax.random.PRNGKey(1), (20, INPUT_SIZE), jnp.float32)
    out_odd = jax.block_until_ready(net_forward(x_odd, params, batch_tile=8))
    assert out_odd.shape == (20, NUM_CLASSES)
    assert jnp.allclose(out_odd, net_forward_ref(x_odd, params), atol=1e-5, rtol=1e-5), \
        "ragged-batch mismatch vs JAX reference"

    print("KERNEL_OK")
</pallas_src>

<mosaic_0001>
module attributes {stable_mosaic.version = 11 : i64} {
  func.func @mlp_kernel(%arg0: i32, %arg1: memref<8x32xf32, #tpu.memory_space<vmem>>, %arg2: memref<32x64xf32, #tpu.memory_space<vmem>>, %arg3: memref<1x64xf32, #tpu.memory_space<vmem>>, %arg4: memref<64x64xf32, #tpu.memory_space<vmem>>, %arg5: memref<1x64xf32, #tpu.memory_space<vmem>>, %arg6: memref<64x8xf32, #tpu.memory_space<vmem>>, %arg7: memref<1x8xf32, #tpu.memory_space<vmem>>, %arg8: memref<8x8xf32, #tpu.memory_space<vmem>>) attributes {dimension_semantics = [#tpu.dimension_semantics<parallel>], iteration_bounds = array<i64: 2>, scalar_prefetch = 0 : i64, scratch_operands = 0 : i64, tpu.core_type = #tpu.core_type<tc>, window_params = [{transform_indices = @transform_0, window_bounds = array<i64: 8, 32>}, {pipeline_mode = #tpu.pipeline_mode<synchronous>, transform_indices = @transform_1, window_bounds = array<i64: 32, 64>}, {pipeline_mode = #tpu.pipeline_mode<synchronous>, transform_indices = @transform_2, window_bounds = array<i64: 1, 64>}, {pipeline_mode = #tpu.pipeline_mode<synchronous>, transform_indices = @transform_3, window_bounds = array<i64: 64, 64>}, {pipeline_mode = #tpu.pipeline_mode<synchronous>, transform_indices = @transform_4, window_bounds = array<i64: 1, 64>}, {pipeline_mode = #tpu.pipeline_mode<synchronous>, transform_indices = @transform_5, window_bounds = array<i64: 64, 8>}, {pipeline_mode = #tpu.pipeline_mode<synchronous>, transform_indices = @transform_6, window_bounds = array<i64: 1, 8>}, {transform_indices = @transform_7, window_bounds = array<i64: 8, 8>}]} {
    %c0 = arith.constant 0 : index
    %c0_0 = arith.constant 0 : index
    %0 = vector.load %arg1[%c0, %c0_0] : memref<8x32xf32, #tpu.memory_space<vmem>>, vector<8x32xf32>
    %c0_1 = arith.constant 0 : index
    %c0_2 = arith.constant 0 : index
    %1 = vector.load %arg2[%c0_1, %c0_2] : memref<32x64xf32, #tpu.memory_space<vmem>>, vector<32x64xf32>
    %cst = arith.constant dense<0.000000e+00> : vector<8x64xf32>
    %2 = tpu.matmul %0, %1, %cst {dimension_numbers = #tpu.dot_dimension_numbers<[1], [0], [0], [1], [0, 0, 1, 1], [], []>} : vector<8x32xf32>, vector<32x64xf32>, vector<8x64xf32> -> vector<8x64xf32>
    %c0_3 = arith.constant 0 : index
    %c0_4 = arith.constant 0 : index
    %3 = vector.load %arg3[%c0_3, %c0_4] : memref<1x64xf32, #tpu.memory_space<vmem>>, vector<1x64xf32>
    %4 = vector.broadcast %3 : vector<1x64xf32> to vector<8x64xf32>
    %5 = arith.addf %2, %4 : vector<8x64xf32>
    %cst_5 = arith.constant 0.000000e+00 : f32
    %6 = vector.broadcast %cst_5 : f32 to vector<8x64xf32>
    %7 = arith.maximumf %5, %6 : vector<8x64xf32>
    %c0_6 = arith.constant 0 : index
    %c0_7 = arith.constant 0 : index
    %8 = vector.load %arg4[%c0_6, %c0_7] : memref<64x64xf32, #tpu.memory_space<vmem>>, vector<64x64xf32>
    %cst_8 = arith.constant dense<0.000000e+00> : vector<8x64xf32>
    %9 = tpu.matmul %7, %8, %cst_8 {dimension_numbers = #tpu.dot_dimension_numbers<[1], [0], [0], [1], [0, 0, 1, 1], [], []>} : vector<8x64xf32>, vector<64x64xf32>, vector<8x64xf32> -> vector<8x64xf32>
    %c0_9 = arith.constant 0 : index
    %c0_10 = arith.constant 0 : index
    %10 = vector.load %arg5[%c0_9, %c0_10] : memref<1x64xf32, #tpu.memory_space<vmem>>, vector<1x64xf32>
    %11 = vector.broadcast %10 : vector<1x64xf32> to vector<8x64xf32>
    %12 = arith.addf %9, %11 : vector<8x64xf32>
    %cst_11 = arith.constant 0.000000e+00 : f32
    %13 = vector.broadcast %cst_11 : f32 to vector<8x64xf32>
    %14 = arith.maximumf %12, %13 : vector<8x64xf32>
    %c0_12 = arith.constant 0 : index
    %c0_13 = arith.constant 0 : index
    %15 = vector.load %arg6[%c0_12, %c0_13] : memref<64x8xf32, #tpu.memory_space<vmem>>, vector<64x8xf32>
    %cst_14 = arith.constant dense<0.000000e+00> : vector<8x8xf32>
    %16 = tpu.matmul %14, %15, %cst_14 {dimension_numbers = #tpu.dot_dimension_numbers<[1], [0], [0], [1], [0, 0, 1, 1], [], []>} : vector<8x64xf32>, vector<64x8xf32>, vector<8x8xf32> -> vector<8x8xf32>
    %c0_15 = arith.constant 0 : index
    %c0_16 = arith.constant 0 : index
    %17 = vector.load %arg7[%c0_15, %c0_16] : memref<1x8xf32, #tpu.memory_space<vmem>>, vector<1x8xf32>
    %18 = vector.broadcast %17 : vector<1x8xf32> to vector<8x8xf32>
    %19 = arith.addf %16, %18 : vector<8x8xf32>
    %c0_17 = arith.constant 0 : index
    %c0_18 = arith.constant 0 : index
    %20 = vector.load %arg8[%c0_17, %c0_18] : memref<8x8xf32, #tpu.memory_space<vmem>>, vector<8x8xf32>
    tpu.vector_store %arg8[%c0_17, %c0_18], %19 {strides = array<i32>} : memref<8x8xf32, #tpu.memory_space<vmem>>, vector<8x8xf32>,
    return
  }
  func.func @transform_0(%arg0: i32) -> (i32, i32) {
    %c0_i32 = arith.constant 0 : i32
    %c0_i32_0 = arith.constant 0 : i32
    return %arg0, %c0_i32 : i32, i32
  }
  func.func @transform_1(%arg0: i32) -> (i32, i32) {
    %c0_i32 = arith.constant 0 : i32
    %c0_i32_0 = arith.constant 0 : i32
    %c0_i32_1 = arith.constant 0 : i32
    return %c0_i32, %c0_i32_0 : i32, i32
  }
  func.func @transform_2(%arg0: i32) -> (i32, i32) {
    %c0_i32 = arith.constant 0 : i32
    %c0_i32_0 = arith.constant 0 : i32
    %c0_i32_1 = arith.constant 0 : i32
    return %c0_i32, %c0_i32_0 : i32, i32
  }
  func.func @transform_3(%arg0: i32) -> (i32, i32) {
    %c0_i32 = arith.constant 0 : i32
    %c0_i32_0 = arith.constant 0 : i32
    %c0_i32_1 = arith.constant 0 : i32
    return %c0_i32, %c0_i32_0 : i32, i32
  }
  func.func @transform_4(%arg0: i32) -> (i32, i32) {
    %c0_i32 = arith.constant 0 : i32
    %c0_i32_0 = arith.constant 0 : i32
    %c0_i32_1 = arith.constant 0 : i32
    return %c0_i32, %c0_i32_0 : i32, i32
  }
  func.func @transform_5(%arg0: i32) -> (i32, i32) {
    %c0_i32 = arith.constant 0 : i32
    %c0_i32_0 = arith.constant 0 : i32
    %c0_i32_1 = arith.constant 0 : i32
    return %c0_i32, %c0_i32_0 : i32, i32
  }
  func.func @transform_6(%arg0: i32) -> (i32, i32) {
    %c0_i32 = arith.constant 0 : i32
    %c0_i32_0 = arith.constant 0 : i32
    %c0_i32_1 = arith.constant 0 : i32
    return %c0_i32, %c0_i32_0 : i32, i32
  }
  func.func @transform_7(%arg0: i32) -> (i32, i32) {
    %c0_i32 = arith.constant 0 : i32
    %c0_i32_0 = arith.constant 0 : i32
    return %arg0, %c0_i32 : i32, i32
  }
}

</mosaic_0001>

<bundles_post_ra>
// kernel: _fused_mlp.1
= control target key start
LH: loop header
LB: loop body
LE: loop exit
PB: predicated region body
PF: predicated region fallthrough
CT: control target
= control target key end

     0   :  { %12 = vsyncpa [#allocation3], 0  ;;  %s850_s24 = smov 0   ;;  %s973_s0 = inlined_call_operand.vmem [shape: f32[16,32], index: 0, kind: input, shape index: {}]   ;;  %s974_s1 = inlined_call_operand.hbm [shape: f32[32,64], index: 1, kind: input, shape index: {}]   ;;  %s975_s2 = inlined_call_operand.vmem [shape: f32[1,64], index: 2, kind: input, shape index: {}]   ;;  %s976_s3 = inlined_call_operand.vmem [shape: f32[64,64], index: 3, kind: input, shape index: {}]   ;;  %s977_s4 = inlined_call_operand.vmem [shape: f32[1,64], index: 4, kind: input, shape index: {}]   ;;  %s978_s5 = inlined_call_operand.vmem [shape: f32[64,8], index: 5, kind: input, shape index: {}]   ;;  %s979_s6 = inlined_call_operand.vmem [shape: f32[1,8], index: 6, kind: input, shape index: {}]   ;;  %s980_s7 = inlined_call_operand.vmem [shape: f32[16,8], index: 7, kind: output, shape index: {}]  }
   0x1 LB: > { %s856_s25 = sadd.s32 4294967295, %s802_s24   ;;  %p623_p0 = scmp.ge.s32.totalorder %s802_s24, 1  ;;  %s802_s24 = sphi %s850_s24, %s18_s24  }
   0x2   : > { %p201_p1 = scmp.lt.s32.totalorder %s802_s24, 3  ;;  %s804_s26 = smov [#allocation2]  }
   0x3   : > { %s213_s27 = sshll.u32 %s804_s26, 4  ;;  %p981_p3 = scmp.eq.s32.totalorder %s856_s25, 0  ;;  %s214_s27 = int_to_ptr.vmem [resolvable:$true] %s213_s27 }
   0x4   : > { %p860_p2 = pnand %p623_p0, %p201_p1  ;;  %s764_s9 = scalar_lea.hbm %s974_s1, 512 }
   0x5   : > { %p765_p6 = scmp.ne.s32.totalorder %s974_s1, %s764_s9  ;;  %p771_p10 = scmp.lt.u32.totalorder %s764_s9, %s974_s1 }
   0x6   : > { %s983_s28 = scalar_select %p860_p2, 1, 0 }
   0x7   : > { %p744_p4 = pneg %p860_p2 }
   0x9   : > { %p869_p5 = pnand %p981_p3, %p744_p4 }
   0xb   : > { %p766_p7 = pneg %p869_p5 }
   0xd   : > { %p767_p8 = pnand %p766_p7, %p765_p6 }
   0xf   : > { %p768_p9 = pneg %p767_p8 }
  0x11   : > { %p773_p11 = pnand %p771_p10, %p768_p9 }
  0x13   : > { %776 = shalt.err (!%p773_p11)
}
  0x14   : > { %s777_s14 = scalar_lea.vmem %s214_s27, 512  ;;  %p785_p1 = scmp.lt.s32.totalorder %s214_s27, %s214_s27 }
  0x15   : > { %p778_p12 = scmp.ne.s32.totalorder %s214_s27, %s777_s14  ;;  %p786_p4 = scmp.lt.s32.totalorder %s777_s14, %s777_s14 }
  0x17   : > { %p780_p13 = pnand %p778_p12, %p766_p7  ;;  %p787_p3 = por %p786_p4, %p785_p1 }
  0x19   : > { %p781_p0 = pneg %p780_p13 }
  0x1b   : > { %p788_p2 = pnand %p787_p3, %p781_p0 }
  0x1d   : > { %791 = shalt.err (!%p788_p2)
}
  0x1e   : > { %s805_s15 = smov 128   ;;  %s806_s16 = smov 8  }
  0x1f   : > { %747 = dma.hbm_to_vmem [thread:$0]  (!%p869_p5), %s974_s1, 512, %s214_s27, [#allocation3], %s805_s15, %s805_s15, %s806_s16  }
  0x20   : > { %p985_p6 = scmp.ne.s32.totalorder %s983_s28, 0 }
  0x21   : > { %p986_p8 = scmp.eq.s32.totalorder (!%p985_p6), %s856_s25, 0 }
  0x22   : > { %251 = sbr.rel (%p985_p6) target bundleno = 699 (0x2bb), region = 48 }
  0x29   : > { %797 = dma.done.wait (%p986_p8), [#allocation3], 512   ;;  %p987_p7 = pmov %p986_p8 }
  0x2a   : > { %p281_p2 = scmp.lt.s32.totalorder %s856_s25, 1  ;;  %v807_v0 = vmov 0.0|0.0   ;;  %vm808_vm0 = vmmov 0   ;;  %v809_v1 = vmov 0.0   ;;  %v290_v2 = vld [vmem:[#allocation2] sm:$0xff]  ;;  %v291_v3 = vld [vmem:[#allocation2 + $0x8] sm:$0xff] }
  0x2b   : > { %799 = vsyncadd (%p987_p7), [#allocation3], 4294966784  ;;  %710 = vmatprep.subr.bf16.mxu0 %v807_v0  ;;  %669 = vmatprep.mubr.msk.f32.mxu0 %vm808_vm0, %v809_v1  ;;  %v292_v4 = vld [vmem:[#allocation2 + $0x10] sm:$0xff]  ;;  %v711_v5 = vpack.c.bf16 %v291_v3, %v290_v2  ;;  %v293_v6 = vld [vmem:[#allocation2 + $0x18] sm:$0xff]  ;;  %vm301_vm1 = vcmask 261120   ;;  %vm391_vm2 = vcmask 523264  }
  0x2c   : > { %716 = vmatprep.subr.bf16.mxu1 %v807_v0  ;;  %688 = vmatprep.mubr.msk.f32.mxu1 %vm808_vm0, %v809_v1  ;;  %s989_s25 = smov (!%p281_p2, %s856_s25), 1  ;;  %v376_v7 = vld [vmem:[%s976_s3] sm:$0xff]  ;;  %v377_v8 = vld [vmem:[%s976_s3 + $0x8] sm:$0xff]  ;;  %v378_v9 = vld [vmem:[%s976_s3 + $0x10] sm:$0xff]  ;;  %v714_v11 = vpack.c.bf16 %v293_v6, %v292_v4  ;;  %vm554_vm3 = vcmask 64512  }
  0x2d   : > { %s628_s19 = sshll.u32 %s989_s25, 3  ;;  %v379_v10 = vld [vmem:[%s976_s3 + $0x18] sm:$0xff]  ;;  %712 = vmatpush3.bf16.msra.mxu0 %v711_v5  ;;  %v717_v12 = vpack.c.bf16 %v377_v8, %v376_v7  ;;  %v380_v14 = vld [vmem:[%s976_s3 + $0x20] sm:$0xff]  ;;  %v381_v15 = vld [vmem:[%s976_s3 + $0x28] sm:$0xff] }
  0x2e   : > { %713 = vmatprep.subr.bf16.mxu0 %v807_v0  ;;  %s284_s9 = scalar_lea.vmem %s973_s0, %s628_s19  ;;  %v720_v13 = vpack.c.bf16 %v379_v10, %v378_v9  ;;  %v723_v17 = vpack.c.bf16 %v381_v15, %v380_v14  ;;  %v382_v18 = vld [vmem:[%s976_s3 + $0x30] sm:$0xff]  ;;  %v383_v19 = vld [vmem:[%s976_s3 + $0x38] sm:$0xff]  ;;  %v466_v21 = vld [vmem:[%s978_s5] sm:$0xff]  ;;  %s288_s23 = scalar_lea.vmem %s980_s7, %s628_s19 }
  0x2f   : > { %718 = vmatpush3.bf16.msra.mxu1 %v717_v12  ;;  %v289_v16 = vld [vmem:[%s284_s9] sm:$0xff]  ;;  %v726_v20 = vpack.c.bf16 %v383_v19, %v382_v18  ;;  %v467_v22 = vld [vmem:[%s978_s5 + $0x8] sm:$0xff]  ;;  %v468_v23 = vld [vmem:[%s978_s5 + $0x10] sm:$0xff] }
  0x30   : > { %719 = vmatprep.subr.bf16.mxu1 %v807_v0  ;;  %v729_v24 = vpack.c.bf16 %v467_v22, %v466_v21  ;;  %v469_v25 = vld [vmem:[%s978_s5 + $0x18] sm:$0xff]  ;;  %v470_v27 = vld [vmem:[%s978_s5 + $0x20] sm:$0xff]  ;;  %v471_v28 = vld [vmem:[%s978_s5 + $0x28] sm:$0xff] }
  0x31   : > { %715 = vmatpush3.bf16.msra.mxu0 %v714_v11  ;;  %v732_v26 = vpack.c.bf16 %v469_v25, %v468_v23  ;;  %v735_v29 = vpack.c.bf16 %v471_v28, %v470_v27  ;;  %v630_v30 = vld [vmem:[%s975_s2] ss:$0 sm:$0xff]  ;;  %v472_v35 = vld [vmem:[%s978_s5 + $0x30] sm:$0xff]  ;;  %v473_v36 = vld [vmem:[%s978_s5 + $0x38] sm:$0xff] }
  0x32   : > { %728 = vmatprep.subr.bf16.mxu0 %v807_v0  ;;  %v738_v37 = vpack.c.bf16 %v473_v36, %v472_v35  ;;  %v632_v38 = vld [vmem:[%s977_s4] ss:$0 sm:$0xff] }
  0x33   : > { %721 = vmatpush3.bf16.msra.mxu1 %v720_v13  ;;  %v634_v43 = vld [vmem:[%s979_s6] ss:$0 sm:$0xff] }
  0x34   : > { %670 = vmatmul.mubr.msk.f32.vlgmr.msra.gmra.mrb[0].mxu0 %vm301_vm1, %v289_v16  ;;  %722 = vmatprep.subr.bf16.mxu1 %v807_v0 }
  0x35   : > { %707 = vmatprep.mubr.msk.f32.mxu0 %vm808_vm0, %v809_v1  ;;  %730 = vmatpush3.bf16.msra.mxu0 %v729_v24 }
  0x36   : > { %731 = vmatprep.subr.bf16.mxu0 %v807_v0 }
  0x37   : > { %724 = vmatpush3.bf16.msra.mxu1 %v723_v17 }
  0x38   : > { %725 = vmatprep.subr.bf16.mxu1 %v807_v0 }
  0x39   : > { %733 = vmatpush3.bf16.msra.mxu0 %v732_v26 }
  0x3a   : > { %734 = vmatprep.subr.bf16.mxu0 %v807_v0 }
  0x3b   : > { %727 = vmatpush3.bf16.msra.mxu1 %v726_v20 }
  0x3d   : > { %736 = vmatpush3.bf16.msra.mxu0 %v735_v29 }
  0x3e   : > { %737 = vmatprep.subr.bf16.mxu0 %v807_v0 }
  0x41   : > { %739 = vmatpush3.bf16.msra.mxu0 %v738_v37 }
 0x107   : > { %v371_v31 = vpop.f32.mrb[0].mxu0 }
 0x108   : > { %v372_v32 = vadd.f32 %v630_v30, %v371_v31  ;;  %v671_v33 = vpop.f32.mrb[1].mxu0 }
 0x10a   : > { %v375_v34 = vmax.f32 %v372_v32, 0.0 }
 0x10c   : > { %689 = vmatmul.mubr.msk.f32.vlgmr.msra.gmra.mrb[0].mxu1 %vm391_vm2, %v375_v34 }
 0x1df   : > { %v461_v39 = vpop.f32.mrb[0].mxu1 }
 0x1e0   : > { %v462_v40 = vadd.f32 %v632_v38, %v461_v39  ;;  %v690_v41 = vpop.f32.mrb[1].mxu1 }
 0x1e2   : > { %v465_v42 = vmax.f32 %v462_v40, 0.0 }
 0x1e4   : > { %708 = vmatmul.mubr.msk.f32.vlgmr.msra.gmra.mrb[2].mxu0 %vm391_vm2, %v465_v42 }
 0x2b7   : > { %v550_v44 = vpop.f32.mrb[2].mxu0 }
 0x2b8   : > { %v551_v45 = vadd.f32 %v634_v43, %v550_v44  ;;  %v709_v46 = vpop.f32.mrb[3].mxu0 }
 0x2ba   : > { %555 = vst.msk [vmem:[%s288_s23] sm:$0xff] %vm554_vm3, %v551_v45 }
 0x2bb PF: > { %s18_s24 = sadd.s32 1, %s802_s24  }
 0x2bc   : > { %p15_p3 = scmp.ge.s32.totalorder %s18_s24, 4  }
 0x2be   :  { %17 = sbr.rel (!%p15_p3) target bundleno = 1 (0x1), region = 83 }
 0x2c5   :  { %575 = vsyncpa [#allocation3], 1 }
 0x2c6   :  { %577 = vsyncpa [#allocation3 + $0x1], 1 }

</bundles_post_ra>
